<compile_context>
chip_gen: v7x
topology: tpu7x:2x2x1
jax: 0.10.0
libtpu: 0.0.40
codegen_flags: <defaults>
</compile_context>

<pallas_src>
import jax
import jax.numpy as jnp
from jax.experimental import pallas as pl
from jax.experimental.pallas import tpu as pltpu


def _round_up(x, m):
    return (x + m - 1) // m * m


def _vmem_limit_bytes():
    """75% of physical VMEM, capped; safe headroom on v5e/v6e (128 MiB) and v7x (64 MiB)."""
    try:
        cap = int(pltpu.get_tpu_info().vmem_capacity_bytes)
    except Exception:
        cap = 64 * 1024 * 1024
    return int(min(cap * 3 // 4, 112 * 1024 * 1024))


def _task_classifier_kernel(x_ref, w_ref, b_ref, o_ref):
    k = pl.program_id(1)

    # Single fused matmul: cast the f32 activation tile to bf16 on the VPU and
    # feed the MXU with f32 accumulation.
    partial = jnp.dot(
        x_ref[...].astype(w_ref.dtype), w_ref[...],
        preferred_element_type=jnp.float32,
    )

    # Accumulate directly into the resident f32 output block (same block index
    # across the K axis) — no scratch, no zero-init read-modify-write.
    @pl.when(k == 0)
    def _first():
        o_ref[...] = partial

    @pl.when(k > 0)
    def _accum():
        o_ref[...] += partial

    @pl.when(k == pl.num_programs(1) - 1)
    def _epilogue():
        o_ref[...] += b_ref[...]


def prepare_task_classifier_params(w1, b1, w2, b2, *,
                                   compute_dtype=jnp.bfloat16,
                                   k_tile=1024):
    """One-time (init-time) parameter prep — keep out of the per-call path.

    w1: (hidden, hidden) torch (out_features, in_features) layout; b1: (hidden,)
    w2: (class_num, hidden) torch layout;                          b2: (class_num,)

    Fuses the two bias-only Linears into a single affine map (done in f32):
        W_eff = W1^T @ W2^T   (h_in, class_num)
        b_eff = b1 @ W2^T + b2
    """
    h_out, h_in = w1.shape
    c = w2.shape[0]
    assert w2.shape[1] == h_out, (w2.shape, h_out)
    assert b1.shape == (h_out,) and b2.shape == (c,)

    w1f = jnp.asarray(w1, jnp.float32)
    w2f = jnp.asarray(w2, jnp.float32)
    b1f = jnp.asarray(b1, jnp.float32)
    b2f = jnp.asarray(b2, jnp.float32)

    w_eff = w1f.T @ w2f.T          # (h_in, c), f32
    b_eff = b1f @ w2f.T + b2f      # (c,), f32

    # Lane-dense class dim (multiple of 128) so output stores are unmasked.
    c_pad = _round_up(max(c, 1), 128)
    # Fused-weight contraction tile: single K step up to 4096, else k_tile.
    tk = h_in if h_in <= 4096 else k_tile
    k_pad = _round_up(h_in, tk)

    w_p = jnp.zeros((k_pad, c_pad), compute_dtype)
    w_p = w_p.at[:h_in, :c].set(w_eff.astype(compute_dtype))
    b_p = jnp.zeros((1, c_pad), jnp.float32).at[0, :c].set(b_eff)

    return dict(w=w_p, b=b_p,
                hidden_in=h_in, class_num=c,
                k_tile=tk, compute_dtype=compute_dtype)


def task_classifier_forward(x, params, *, batch_tile=512):
    """x: (B, ...) flattened to (B, hidden) like torch.flatten(x, 1).
    Returns (B, class_num) float32."""
    w, bias = params["w"], params["b"]
    h_in = params["hidden_in"]
    c = params["class_num"]
    tk = params["k_tile"]
    k_pad, c_pad = w.shape

    bsz = x.shape[0]
    x2d = x.reshape(bsz, -1)                      # torch.flatten(x, 1)
    assert x2d.shape[1] == h_in, (x2d.shape, h_in)

    # Batch tiling: large sublane-aligned tiles amortize per-grid-step overhead.
    tb = min(_round_up(bsz, 8), _round_up(batch_tile, 8))
    b_pad = _round_up(bsz, tb)

    # Only materialize a padded copy when actually required; no wrapper-side
    # dtype cast — the kernel casts the f32 tile to bf16 just before the dot.
    if (b_pad, k_pad) != (bsz, h_in):
        x2d = jnp.zeros((b_pad, k_pad), x2d.dtype).at[:bsz, :h_in].set(x2d)

    n_b = b_pad // tb
    n_k = k_pad // tk

    cost = pl.CostEstimate(
        flops=2 * b_pad * k_pad * c_pad,
        transcendentals=0,
        bytes_accessed=(x2d.size * x2d.dtype.itemsize            # x read once
                        + n_b * w.size * w.dtype.itemsize        # W_eff streamed per batch tile
                        + bias.size * bias.dtype.itemsize
                        + b_pad * c_pad * 4),                    # output write
    )

    out = pl.pallas_call(
        _task_classifier_kernel,
        out_shape=jax.ShapeDtypeStruct((b_pad, c_pad), jnp.float32),
        grid_spec=pltpu.PrefetchScalarGridSpec(
            num_scalar_prefetch=0,
            grid=(n_b, n_k),                                     # reduction axis last
            in_specs=[
                pl.BlockSpec((tb, tk), lambda i, k: (i, k)),     # x tile (f32)
                pl.BlockSpec((tk, c_pad), lambda i, k: (k, 0)),  # fused weight K-slab (bf16)
                pl.BlockSpec((1, c_pad), lambda i, k: (0, 0)),   # fused bias (f32, tiny)
            ],
            out_specs=pl.BlockSpec((tb, c_pad), lambda i, k: (i, 0)),
        ),
        compiler_params=pltpu.CompilerParams(
            dimension_semantics=("parallel", "arbitrary"),
            vmem_limit_bytes=_vmem_limit_bytes(),
        ),
        cost_estimate=cost,
    )(x2d, w, bias)

    return out[:bsz, :c]


def _ref_forward_f32(x, w1, b1, w2, b2):
    """Pure-f32 reference matching the torch module's forward semantics."""
    x2d = x.reshape(x.shape[0], -1).astype(jnp.float32)
    h = x2d @ jnp.asarray(w1, jnp.float32).T + jnp.asarray(b1, jnp.float32)
    return h @ jnp.asarray(w2, jnp.float32).T + jnp.asarray(b2, jnp.float32)


def _ref_forward_fused_bf16(x, params):
    """Reference matching the kernel's exact numerics (bf16 operands, f32 accumulate)."""
    h_in, c = params["hidden_in"], params["class_num"]
    x2d = x.reshape(x.shape[0], -1).astype(jnp.bfloat16).astype(jnp.float32)
    wf = params["w"][:h_in, :].astype(jnp.float32)
    y = x2d @ wf + params["b"][0]
    return y[:, :c]


if __name__ == "__main__":
    key = jax.random.PRNGKey(0)
    k_x, k_w1, k_b1, k_w2, k_b2 = jax.random.split(key, 5)

    B, C1, C2 = 2, 4, 8            # forward flattens -> hidden_size = 32
    H = C1 * C2
    CLS = 7

    x = jax.random.normal(k_x, (B, C1, C2), dtype=jnp.float32)
    # Deterministic synthetic params in torch Linear layout (out_features, in_features).
    w1 = jax.random.normal(k_w1, (H, H), dtype=jnp.float32) * jnp.sqrt(2.0 / H)
    b1 = jax.random.normal(k_b1, (H,), dtype=jnp.float32) * 0.01
    w2 = jax.random.normal(k_w2, (CLS, H), dtype=jnp.float32) * jnp.sqrt(2.0 / H)
    b2 = jax.random.normal(k_b2, (CLS,), dtype=jnp.float32) * 0.01

    params = prepare_task_classifier_params(w1, b1, w2, b2)   # one-time prep (incl. fusion)
    y = task_classifier_forward(x, params)
    jax.block_until_ready(y)
    assert y.shape == (B, CLS)

    # Tight check against a reference with the kernel's exact numerics.
    y_fused = _ref_forward_fused_bf16(x, params)
    assert jnp.allclose(y, y_fused, atol=1e-4, rtol=1e-4), float(
        jnp.max(jnp.abs(y - y_fused)))

    # Looser check against the pure-f32 torch-semantics forward (bf16 weights).
    y_ref = _ref_forward_f32(x, w1, b1, w2, b2)
    assert jnp.allclose(y, y_ref, atol=2e-2, rtol=2e-2), float(
        jnp.max(jnp.abs(y - y_ref)))

    # TODO(synk): optimizer construction and initialize_paras() are training-time
    # utilities with no forward-pass Pallas equivalent; not implemented.
    print("KERNEL_OK")
</pallas_src>

<mosaic_0001>
module attributes {stable_mosaic.version = 11 : i64} {
  func.func @_task_classifier_kernel(%arg0: i32, %arg1: i32, %arg2: memref<8x32xf32, #tpu.memory_space<vmem>>, %arg3: memref<32x128xbf16, #tpu.memory_space<vmem>>, %arg4: memref<1x128xf32, #tpu.memory_space<vmem>>, %arg5: memref<8x128xf32, #tpu.memory_space<vmem>>) attributes {dimension_semantics = [#tpu.dimension_semantics<parallel>, #tpu.dimension_semantics<arbitrary>], iteration_bounds = array<i64: 1, 1>, scalar_prefetch = 0 : i64, scratch_operands = 0 : i64, tpu.core_type = #tpu.core_type<tc>, window_params = [{transform_indices = @transform_0, window_bounds = array<i64: 8, 32>}, {transform_indices = @transform_1, window_bounds = array<i64: 32, 128>}, {pipeline_mode = #tpu.pipeline_mode<synchronous>, transform_indices = @transform_2, window_bounds = array<i64: 1, 128>}, {transform_indices = @transform_3, window_bounds = array<i64: 8, 128>}]} {
    %c0 = arith.constant 0 : index
    %c0_0 = arith.constant 0 : index
    %0 = vector.load %arg2[%c0, %c0_0] : memref<8x32xf32, #tpu.memory_space<vmem>>, vector<8x32xf32>
    %1 = arith.truncf %0 : vector<8x32xf32> to vector<8x32xbf16>
    %c0_1 = arith.constant 0 : index
    %c0_2 = arith.constant 0 : index
    %2 = vector.load %arg3[%c0_1, %c0_2] : memref<32x128xbf16, #tpu.memory_space<vmem>>, vector<32x128xbf16>
    %cst = arith.constant dense<0.000000e+00> : vector<8x128xf32>
    %3 = tpu.matmul %1, %2, %cst {dimension_numbers = #tpu.dot_dimension_numbers<[1], [0], [0], [1], [0, 0, 1, 1], [], []>} : vector<8x32xbf16>, vector<32x128xbf16>, vector<8x128xf32> -> vector<8x128xf32>
    %c0_i32 = arith.constant 0 : i32
    %4 = arith.cmpi eq, %arg1, %c0_i32 : i32
    %5 = arith.extui %4 : i1 to i32
    %c0_i32_3 = arith.constant 0 : i32
    %6 = arith.cmpi ne, %5, %c0_i32_3 : i32
    scf.if %6 {
      %c0_8 = arith.constant 0 : index
      %c0_9 = arith.constant 0 : index
      %13 = vector.load %arg5[%c0_8, %c0_9] : memref<8x128xf32, #tpu.memory_space<vmem>>, vector<8x128xf32>
      tpu.vector_store %arg5[%c0_8, %c0_9], %3 {strides = array<i32>} : memref<8x128xf32, #tpu.memory_space<vmem>>, vector<8x128xf32>,
    } else {
    }
    %c0_i32_4 = arith.constant 0 : i32
    %7 = arith.cmpi sgt, %arg1, %c0_i32_4 : i32
    %8 = arith.extui %7 : i1 to i32
    %c0_i32_5 = arith.constant 0 : i32
    %9 = arith.cmpi ne, %8, %c0_i32_5 : i32
    scf.if %9 {
      %c0_8 = arith.constant 0 : index
      %c0_9 = arith.constant 0 : index
      %13 = vector.load %arg5[%c0_8, %c0_9] : memref<8x128xf32, #tpu.memory_space<vmem>>, vector<8x128xf32>
      %14 = arith.addf %13, %3 : vector<8x128xf32>
      %c0_10 = arith.constant 0 : index
      %c0_11 = arith.constant 0 : index
      %15 = vector.load %arg5[%c0_10, %c0_11] : memref<8x128xf32, #tpu.memory_space<vmem>>, vector<8x128xf32>
      tpu.vector_store %arg5[%c0_10, %c0_11], %14 {strides = array<i32>} : memref<8x128xf32, #tpu.memory_space<vmem>>, vector<8x128xf32>,
    } else {
    }
    %c0_i32_6 = arith.constant 0 : i32
    %10 = arith.cmpi eq, %arg1, %c0_i32_6 : i32
    %11 = arith.extui %10 : i1 to i32
    %c0_i32_7 = arith.constant 0 : i32
    %12 = arith.cmpi ne, %11, %c0_i32_7 : i32
    scf.if %12 {
      %c0_8 = arith.constant 0 : index
      %c0_9 = arith.constant 0 : index
      %13 = vector.load %arg5[%c0_8, %c0_9] : memref<8x128xf32, #tpu.memory_space<vmem>>, vector<8x128xf32>
      %c0_10 = arith.constant 0 : index
      %c0_11 = arith.constant 0 : index
      %14 = vector.load %arg4[%c0_10, %c0_11] : memref<1x128xf32, #tpu.memory_space<vmem>>, vector<1x128xf32>
      %15 = vector.broadcast %14 : vector<1x128xf32> to vector<8x128xf32>
      %16 = arith.addf %13, %15 : vector<8x128xf32>
      %c0_12 = arith.constant 0 : index
      %c0_13 = arith.constant 0 : index
      %17 = vector.load %arg5[%c0_12, %c0_13] : memref<8x128xf32, #tpu.memory_space<vmem>>, vector<8x128xf32>
      tpu.vector_store %arg5[%c0_12, %c0_13], %16 {strides = array<i32>} : memref<8x128xf32, #tpu.memory_space<vmem>>, vector<8x128xf32>,
    } else {
    }
    return
  }
  func.func @transform_0(%arg0: i32, %arg1: i32) -> (i32, i32) {
    %c0_i32 = arith.constant 0 : i32
    return %arg0, %arg1 : i32, i32
  }
  func.func @transform_1(%arg0: i32, %arg1: i32) -> (i32, i32) {
    %c0_i32 = arith.constant 0 : i32
    %c0_i32_0 = arith.constant 0 : i32
    return %arg1, %c0_i32 : i32, i32
  }
  func.func @transform_2(%arg0: i32, %arg1: i32) -> (i32, i32) {
    %c0_i32 = arith.constant 0 : i32
    %c0_i32_0 = arith.constant 0 : i32
    %c0_i32_1 = arith.constant 0 : i32
    return %c0_i32, %c0_i32_0 : i32, i32
  }
  func.func @transform_3(%arg0: i32, %arg1: i32) -> (i32, i32) {
    %c0_i32 = arith.constant 0 : i32
    %c0_i32_0 = arith.constant 0 : i32
    return %arg0, %c0_i32 : i32, i32
  }
}

</mosaic_0001>

<bundles_post_ra>
// kernel: tpu_custom_call.1
= control target key start
LH: loop header
LB: loop body
LE: loop exit
PB: predicated region body
PF: predicated region fallthrough
CT: control target
= control target key end

     0   :  { %8 = vsyncpa [#allocation3], 0  ;;  %s314_s0 = inlined_call_operand.hbm [shape: f32[8,32], index: 0, kind: input, shape index: {}]   ;;  %s315_s1 = inlined_call_operand.hbm [shape: bf16[32,128], index: 1, kind: input, shape index: {}]   ;;  %s316_s2 = inlined_call_operand.vmem [shape: f32[1,128], index: 2, kind: input, shape index: {}]   ;;  %s317_s3 = inlined_call_operand.hbm [shape: f32[8,128], index: 3, kind: output, shape index: {}]  }
   0x1   :  { %9 = vsyncpa [#allocation6], 0 }
   0x2   :  { %10 = vsyncpa [#allocation4], 0  ;;  %s241_s12 = smov [#allocation2]   ;;  %s242_s14 = smov [#allocation5]  }
   0x3   :  { %s17_s13 = sshll.u32 %s241_s12, 4  ;;  %s26_s15 = sshll.u32 %s242_s14, 4  ;;  %s18_s13 = int_to_ptr.vmem [resolvable:$true] %s17_s13  ;;  %s268_s15 = int_to_ptr.vmem [resolvable:$true] %s26_s15 }
   0x4   :  { %s169_s18 = scalar_lea.hbm %s314_s0, 128 }
   0x5   :  { %p170_p0 = scmp.ne.s32.totalorder %s314_s0, %s169_s18  ;;  %p173_p1 = scmp.lt.u32.totalorder %s169_s18, %s314_s0 }
   0x7   :  { %p175_p2 = pnand %p173_p1, %p170_p0 }
   0x9   :  { %178 = shalt.err (!%p175_p2)
}
   0xa   :  { %s179_s23 = scalar_lea.vmem %s18_s13, 128  ;;  %p184_p4 = scmp.lt.s32.totalorder %s18_s13, %s18_s13 }
   0xb   :  { %p180_p3 = scmp.ne.s32.totalorder %s18_s13, %s179_s23  ;;  %p185_p5 = scmp.lt.s32.totalorder %s179_s23, %s179_s23 }
   0xd   :  { %p186_p6 = por %p185_p5, %p184_p4 }
   0xf   :  { %p187_p7 = pnand %p186_p6, %p180_p3 }
  0x11   :  { %190 = shalt.err (!%p187_p7)
}
  0x12   :  { %20 = dma.hbm_to_vmem [thread:$0]  %s314_s0, 128, %s18_s13, [#allocation3]  }
  0x13   :  { %s191_s28 = scalar_lea.hbm %s315_s1, 256 }
  0x14   :  { %p192_p8 = scmp.ne.s32.totalorder %s315_s1, %s191_s28  ;;  %p195_p9 = scmp.lt.u32.totalorder %s191_s28, %s315_s1 }
  0x16   :  { %p197_p10 = pnand %p195_p9, %p192_p8 }
  0x18   :  { %200 = shalt.err (!%p197_p10)
}
  0x19   :  { %s201_s6 = scalar_lea.vmem %s268_s15, 256  ;;  %p206_p12 = scmp.lt.s32.totalorder %s268_s15, %s268_s15 }
  0x1a   :  { %p202_p11 = scmp.ne.s32.totalorder %s268_s15, %s201_s6  ;;  %p207_p13 = scmp.lt.s32.totalorder %s201_s6, %s201_s6 }
  0x1c   :  { %p208_p0 = por %p207_p13, %p206_p12 }
  0x1e   :  { %p209_p1 = pnand %p208_p0, %p202_p11 }
  0x20   :  { %212 = shalt.err (!%p209_p1)
}
  0x21   :  { %s243_s0 = smov 64   ;;  %s244_s7 = smov 4  }
  0x22   :  { %32 = dma.hbm_to_vmem [thread:$0]  %s315_s1, 256, %s268_s15, [#allocation6], %s243_s0, %s243_s0, %s244_s7  }
  0x23   :  { %235 = dma.done.wait [#allocation3], 128  }
  0x24   :  { %236 = vsyncadd [#allocation3], 4294967168 }
  0x25   :  { %237 = dma.done.wait [#allocation6], 256  }
  0x26   :  { %238 = vsyncadd [#allocation6], 4294967040  ;;  %v245_v0 = vmov 0.0   ;;  %vm246_vm0 = vmmov 0   ;;  %v167_v1 = vld [vmem:[#allocation5] sm:$0xff]   ;;  %v168_v2 = vld [vmem:[#allocation5 + $0x8] sm:$0xff]  }
  0x27   :  { %152 = vmatprep.subr.bf16.mxu0 %v245_v0  ;;  %156 = vmatprep.mubr.msk.bf16.mxu0 %vm246_vm0, %v245_v0  ;;  %v42_v3 = vld [vmem:[#allocation2] sm:$0xff]  ;;  %vm60_vm1 = vcmask 261120   ;;  %s247_s1 = smov [#allocation7]  }
  0x28   :  { %153 = vmatpush3.bf16.msra.mxu0 %v167_v1  ;;  %v43_v4 = vpack.c.bf16 %v42_v3, %v42_v3  ;;  %v148_v5 = vld [vmem:[%s316_s2] ss:$0 sm:$0xff]  ;;  %s135_s12 = sshll.u32 %s247_s1, 4  ;;  %s136_s12 = int_to_ptr.vmem [resolvable:$true] %s135_s12 }
  0x29   :  { %154 = vmatprep.subr.bf16.mxu0 %v245_v0  ;;  %s213_s13 = scalar_lea.vmem %s136_s12, 128  ;;  %p218_p3 = scmp.lt.s32.totalorder %s136_s12, %s136_s12 }
  0x2a   :  { %p214_p2 = scmp.ne.s32.totalorder %s136_s12, %s213_s13  ;;  %p219_p4 = scmp.lt.s32.totalorder %s213_s13, %s213_s13 }
  0x2c   :  { %155 = vmatpush3.bf16.msra.mxu0 %v168_v2  ;;  %p220_p5 = por %p219_p4, %p218_p3 }
  0x2e   :  { %p221_p6 = pnand %p220_p5, %p214_p2 }
  0x2f   :  { %157 = vmatmul.mubr.msk.bf16.vlgmr.msra.gmra.mrb[0].mxu0 %vm60_vm1, %v43_v4 }
 0x102   :  { %v98_v6 = vpop.f32.mrb[0].mxu0 }
 0x103   :  { %v158_v7 = vpop.f32.mrb[1].mxu0  ;;  %v127_v8 = vadd.f32 %v148_v5, %v98_v6 }
 0x104   :  { %v101_v9 = vpop.f32.mrb[2].mxu0 }
 0x105   :  { %v159_v10 = vpop.f32.mrb[3].mxu0  ;;  %128 = vst [vmem:[#allocation7] sm:$0xff] %v127_v8 }
 0x106   :  { %224 = shalt.err (!%p221_p6)
}
 0x107   :  { %s225_s2 = scalar_lea.hbm %s317_s3, 128 }
 0x108   :  { %p226_p7 = scmp.ne.s32.totalorder %s317_s3, %s225_s2  ;;  %p229_p8 = scmp.lt.u32.totalorder %s225_s2, %s317_s3 }
 0x10a   :  { %p231_p9 = pnand %p229_p8, %p226_p7 }
 0x10c   :  { %234 = shalt.err (!%p231_p9)
}
 0x10d   :  { %138 = dma.vmem_to_hbm [thread:$0]  %s136_s12, 128, %s317_s3, [#allocation4]  }
 0x10e   :  { %239 = dma.done.wait [#allocation4], 128  }
 0x10f   :  { %240 = vsyncadd [#allocation4], 4294967168 }
 0x110   :  { %142 = vsyncpa [#allocation3], 1 }
 0x111   :  { %143 = vsyncpa [#allocation6], 1 }
 0x112   :  { %144 = vsyncpa [#allocation4], 1 }

</bundles_post_ra>
